<compile_context>
chip_gen: v7x
topology: tpu7x:2x2x1
jax: 0.10.0
libtpu: 0.0.40
codegen_flags: <defaults>
</compile_context>

<pallas_src>
import math
import functools

import jax
import jax.numpy as jnp
from jax import lax
from jax.experimental import pallas as pl
from jax.experimental.pallas import tpu as pltpu

EPS = 1e-12  # matches torch.nn.functional.normalize default eps


def _arcmargin_kernel(label_ref, x_ref, wt_ref, out_ref, cos_ref, *,
                      s, cos_m, sin_m, th, mm, easy_margin):
    xn = x_ref[...]            # (TB, D)  bf16, already row-normalized
    wn = wt_ref[...]           # (D, TO)  bf16, already column-normalized (W^T)
    label = label_ref[...]     # (TB, 1)  int32

    # cosine tile: (TB, D) x (D, TO) on the MXU, f32 accumulation.
    cosine = jnp.dot(xn, wn, preferred_element_type=jnp.float32)   # (TB, TO) f32

    tb, to = cosine.shape
    # one-hot columns, offset by the class-tile origin (class axis is grid dim 0).
    col_ids = pl.program_id(0) * to + lax.broadcasted_iota(jnp.int32, (tb, to), 1)
    one_hot = col_ids == label                                     # (TB, TO)

    # Per-row margin math on the label column only (XLU reduce + O(TB) VPU/EUP work).
    cos_l = jnp.sum(jnp.where(one_hot, cosine, 0.0), axis=-1, keepdims=True)  # (TB,1)
    sin_l = jnp.sqrt(jnp.maximum(1.0 - cos_l * cos_l, 0.0))
    phi = cos_l * cos_m - sin_l * sin_m
    if easy_margin:
        phi = jnp.where(cos_l > 0.0, phi, cos_l)
    else:
        phi = jnp.where(cos_l > th, phi, cos_l - mm)
    delta = (phi - cos_l) * s                                       # (TB, 1)

    # output = s*cosine everywhere, plus s*(phi - cos_label) at the label column.
    out_ref[...] = (cosine * s + jnp.where(one_hot, delta, 0.0)).astype(out_ref.dtype)
    cos_ref[...] = cosine.astype(cos_ref.dtype)


def arc_margin_product(x, weight, label, *, s=30.0, m=0.5, easy_margin=False,
                       block_b=256, block_o=1024, mxu_dtype=jnp.bfloat16,
                       cosine_dtype=jnp.float32):
    """Pallas forward of ArcMarginProduct.

    x:      (B, D) float
    weight: (O, D) float   (module layout, as in PyTorch)
    label:  (B,)   int
    returns (output, cosine): output is f32 (B, O), cosine is cosine_dtype (B, O).
    """
    B, D = x.shape
    O, D2 = weight.shape
    assert D == D2

    tb = min(block_b, B)
    to = min(block_o, O)
    Bp = pl.cdiv(B, tb) * tb
    Op = pl.cdiv(O, to) * to

    # One-time host-side prep (fused by XLA, hoisted out of the per-tile hot loop):
    #   * L2-normalize rows of x and rows of W in f32 (F.normalize semantics:
    #     v / max(||v||, eps)  ==  v * rsqrt(max(sum v^2, eps^2))).
    #   * transpose W to MXU-native (K, N) and cast both operands to bf16.
    xf = x.astype(jnp.float32)
    xn = xf * lax.rsqrt(jnp.maximum(jnp.sum(xf * xf, axis=-1, keepdims=True),
                                    EPS * EPS))
    wf = weight.astype(jnp.float32)
    wn = wf * lax.rsqrt(jnp.maximum(jnp.sum(wf * wf, axis=-1, keepdims=True),
                                    EPS * EPS))
    xn = xn.astype(mxu_dtype)                    # (B, D)
    wnt = wn.T.astype(mxu_dtype)                 # (D, O)

    label2d = label.reshape(B, 1).astype(jnp.int32)

    if Bp != B:
        xn = jnp.pad(xn, ((0, Bp - B), (0, 0)))
        label2d = jnp.pad(label2d, ((0, Bp - B), (0, 0)))
    if Op != O:
        wnt = jnp.pad(wnt, ((0, 0), (0, Op - O)))   # padded cols -> cosine 0

    kernel = functools.partial(
        _arcmargin_kernel,
        s=float(s),
        cos_m=float(math.cos(m)),
        sin_m=float(math.sin(m)),
        th=float(math.cos(math.pi - m)),
        mm=float(math.sin(math.pi - m) * m),
        easy_margin=easy_margin,
    )

    out, cosine = pl.pallas_call(
        kernel,
        out_shape=(
            jax.ShapeDtypeStruct((Bp, Op), jnp.float32),
            jax.ShapeDtypeStruct((Bp, Op), cosine_dtype),
        ),
        grid_spec=pltpu.PrefetchScalarGridSpec(
            num_scalar_prefetch=0,
            # class tiles OUTER, batch tiles INNER: W^T tile stays resident
            # across the inner sweep; only tiny x/label tiles are re-fetched.
            grid=(Op // to, Bp // tb),
            in_specs=[
                pl.BlockSpec((tb, 1), lambda j, i: (i, 0)),   # label
                pl.BlockSpec((tb, D), lambda j, i: (i, 0)),   # xn (normalized, bf16)
                pl.BlockSpec((D, to), lambda j, i: (0, j)),   # W^T (normalized, bf16)
            ],
            out_specs=[
                pl.BlockSpec((tb, to), lambda j, i: (i, j)),
                pl.BlockSpec((tb, to), lambda j, i: (i, j)),
            ],
        ),
        compiler_params=pltpu.CompilerParams(
            dimension_semantics=("parallel", "parallel")),
    )(label2d, xn, wnt)

    if Bp != B or Op != O:
        out = out[:B, :O]
        cosine = cosine[:B, :O]
    return out, cosine


def _reference(x, weight, label, *, s=30.0, m=0.5, easy_margin=False,
               operand_dtype=None):
    # Pure-JAX reference mirroring the PyTorch code.  If operand_dtype is set,
    # the normalized operands are rounded to that dtype before the matmul so
    # the comparison matches the kernel's bf16 MXU feed bit-for-bit (up to
    # accumulation order).
    def normalize(v):
        n = jnp.sqrt(jnp.sum(v * v, axis=-1, keepdims=True))
        return v / jnp.maximum(n, EPS)

    xn = normalize(x)
    wn = normalize(weight)
    if operand_dtype is not None:
        xn = xn.astype(operand_dtype).astype(jnp.float32)
        wn = wn.astype(operand_dtype).astype(jnp.float32)
    cosine = xn @ wn.T
    sine = jnp.sqrt(jnp.clip(1.0 - cosine ** 2, 0.0, 1.0))
    phi = cosine * math.cos(m) - sine * math.sin(m)
    if easy_margin:
        phi = jnp.where(cosine > 0, phi, cosine)
    else:
        phi = jnp.where(cosine > math.cos(math.pi - m),
                        phi, cosine - math.sin(math.pi - m) * m)
    one_hot = jax.nn.one_hot(label, weight.shape[0], dtype=cosine.dtype)
    output = (one_hot * phi + (1.0 - one_hot) * cosine) * s
    return output, cosine


if __name__ == "__main__":
    # Small, shape-consistent example: B=16, in_features=32, out_features=256.
    # Tiles chosen so the grid is (2 class tiles, 2 batch tiles), exercising the
    # class-tile one-hot offset and the resident-W inner sweep.
    B, IN_FEATURES, OUT_FEATURES = 16, 32, 256

    key = jax.random.PRNGKey(0)
    kx, kw, kl = jax.random.split(key, 3)

    # Deterministic parameter init: xavier_uniform_ on weight (O, D).
    bound = math.sqrt(6.0 / (IN_FEATURES + OUT_FEATURES))
    weight = jax.random.uniform(
        kw, (OUT_FEATURES, IN_FEATURES), jnp.float32, minval=-bound, maxval=bound)

    x = jax.random.normal(kx, (B, IN_FEATURES), jnp.float32)
    label = jax.random.randint(kl, (B,), 0, OUT_FEATURES, dtype=jnp.int32)

    out, cosine = arc_margin_product(x, weight, label, s=30.0, m=0.5,
                                     easy_margin=False,
                                     block_b=8, block_o=128)
    jax.block_until_ready((out, cosine))

    # Tight check against a reference that feeds the matmul the same bf16-rounded
    # normalized operands (f32 accumulation in both).
    ref_out_b, ref_cos_b = _reference(x, weight, label, s=30.0, m=0.5,
                                      easy_margin=False,
                                      operand_dtype=jnp.bfloat16)
    assert jnp.allclose(cosine, ref_cos_b, atol=1e-5, rtol=1e-5)
    assert jnp.allclose(out, ref_out_b, atol=1e-4, rtol=1e-4)

    # Loose sanity check against the pure-f32 reference (bf16 operand rounding
    # bounds the cosine error by ~||xn||*||wn||*eps_bf16).
    ref_out, ref_cos = _reference(x, weight, label, s=30.0, m=0.5,
                                  easy_margin=False)
    assert jnp.allclose(cosine, ref_cos, atol=2e-2, rtol=0.0)
    assert jnp.allclose(out, ref_out, atol=0.6, rtol=0.0)

    print("KERNEL_OK")
</pallas_src>

<mosaic_0001>
module attributes {stable_mosaic.version = 11 : i64} {
  func.func @_arcmargin_kernel(%arg0: i32, %arg1: i32, %arg2: memref<8x1xi32, #tpu.memory_space<vmem>>, %arg3: memref<8x32xbf16, #tpu.memory_space<vmem>>, %arg4: memref<32x128xbf16, #tpu.memory_space<vmem>>, %arg5: memref<8x128xf32, #tpu.memory_space<vmem>>, %arg6: memref<8x128xf32, #tpu.memory_space<vmem>>) attributes {dimension_semantics = [#tpu.dimension_semantics<parallel>, #tpu.dimension_semantics<parallel>], iteration_bounds = array<i64: 2, 2>, scalar_prefetch = 0 : i64, scratch_operands = 0 : i64, tpu.core_type = #tpu.core_type<tc>, window_params = [{transform_indices = @transform_0, window_bounds = array<i64: 8, 1>}, {transform_indices = @transform_1, window_bounds = array<i64: 8, 32>}, {transform_indices = @transform_2, window_bounds = array<i64: 32, 128>}, {transform_indices = @transform_3, window_bounds = array<i64: 8, 128>}, {transform_indices = @transform_4, window_bounds = array<i64: 8, 128>}]} {
    %c0 = arith.constant 0 : index
    %c0_0 = arith.constant 0 : index
    %0 = vector.load %arg3[%c0, %c0_0] : memref<8x32xbf16, #tpu.memory_space<vmem>>, vector<8x32xbf16>
    %c0_1 = arith.constant 0 : index
    %c0_2 = arith.constant 0 : index
    %1 = vector.load %arg4[%c0_1, %c0_2] : memref<32x128xbf16, #tpu.memory_space<vmem>>, vector<32x128xbf16>
    %c0_3 = arith.constant 0 : index
    %c0_4 = arith.constant 0 : index
    %2 = vector.load %arg2[%c0_3, %c0_4] : memref<8x1xi32, #tpu.memory_space<vmem>>, vector<8x1xi32>
    %cst = arith.constant dense<0.000000e+00> : vector<8x128xf32>
    %3 = tpu.matmul %0, %1, %cst {dimension_numbers = #tpu.dot_dimension_numbers<[1], [0], [0], [1], [0, 0, 1, 1], [], []>} : vector<8x32xbf16>, vector<32x128xbf16>, vector<8x128xf32> -> vector<8x128xf32>
    %c128_i32 = arith.constant 128 : i32
    %4 = arith.muli %arg0, %c128_i32 : i32
    %5 = tpu.iota {dimensions = array<i32: 1>} : vector<8x128xi32>
    %6 = vector.broadcast %4 : i32 to vector<8x128xi32>
    %7 = arith.addi %6, %5 : vector<8x128xi32>
    %8 = vector.broadcast %2 : vector<8x1xi32> to vector<8x128xi32>
    %9 = arith.cmpi eq, %7, %8 : vector<8x128xi32>
    %cst_5 = arith.constant 0.000000e+00 : f32
    %10 = vector.broadcast %cst_5 : f32 to vector<8x128xf32>
    %11 = arith.select %9, %3, %10 : vector<8x128xi1>, vector<8x128xf32>
    %cst_6 = arith.constant dense<0.000000e+00> : vector<8xf32>
    %12 = vector.multi_reduction <add>, %11, %cst_6 [1] : vector<8x128xf32> to vector<8xf32>
    %13 = vector.shape_cast %12 : vector<8xf32> to vector<8x1xf32>
    %14 = arith.mulf %13, %13 : vector<8x1xf32>
    %cst_7 = arith.constant 1.000000e+00 : f32
    %15 = vector.broadcast %cst_7 : f32 to vector<8x1xf32>
    %16 = arith.subf %15, %14 : vector<8x1xf32>
    %cst_8 = arith.constant 0.000000e+00 : f32
    %17 = vector.broadcast %cst_8 : f32 to vector<8x1xf32>
    %18 = arith.maximumf %16, %17 : vector<8x1xf32>
    %19 = math.sqrt %18 : vector<8x1xf32>
    %cst_9 = arith.constant 0.87758255 : f32
    %20 = vector.broadcast %cst_9 : f32 to vector<8x1xf32>
    %21 = arith.mulf %13, %20 : vector<8x1xf32>
    %cst_10 = arith.constant 0.47942555 : f32
    %22 = vector.broadcast %cst_10 : f32 to vector<8x1xf32>
    %23 = arith.mulf %19, %22 : vector<8x1xf32>
    %24 = arith.subf %21, %23 : vector<8x1xf32>
    %cst_11 = arith.constant -0.87758255 : f32
    %25 = vector.broadcast %cst_11 : f32 to vector<8x1xf32>
    %26 = arith.cmpf ogt, %13, %25 : vector<8x1xf32>
    %cst_12 = arith.constant 0.239712775 : f32
    %27 = vector.broadcast %cst_12 : f32 to vector<8x1xf32>
    %28 = arith.subf %13, %27 : vector<8x1xf32>
    %29 = arith.select %26, %24, %28 : vector<8x1xi1>, vector<8x1xf32>
    %30 = arith.subf %29, %13 : vector<8x1xf32>
    %cst_13 = arith.constant 3.000000e+01 : f32
    %31 = vector.broadcast %cst_13 : f32 to vector<8x1xf32>
    %32 = arith.mulf %30, %31 : vector<8x1xf32>
    %cst_14 = arith.constant 3.000000e+01 : f32
    %33 = vector.broadcast %cst_14 : f32 to vector<8x128xf32>
    %34 = arith.mulf %3, %33 : vector<8x128xf32>
    %cst_15 = arith.constant 0.000000e+00 : f32
    %35 = vector.shape_cast %32 : vector<8x1xf32> to vector<8x1xf32>
    %36 = vector.broadcast %35 : vector<8x1xf32> to vector<8x128xf32>
    %37 = vector.broadcast %cst_15 : f32 to vector<8x128xf32>
    %38 = arith.select %9, %36, %37 : vector<8x128xi1>, vector<8x128xf32>
    %39 = arith.addf %34, %38 : vector<8x128xf32>
    %c0_16 = arith.constant 0 : index
    %c0_17 = arith.constant 0 : index
    %40 = vector.load %arg5[%c0_16, %c0_17] : memref<8x128xf32, #tpu.memory_space<vmem>>, vector<8x128xf32>
    tpu.vector_store %arg5[%c0_16, %c0_17], %39 {strides = array<i32>} : memref<8x128xf32, #tpu.memory_space<vmem>>, vector<8x128xf32>,
    %c0_18 = arith.constant 0 : index
    %c0_19 = arith.constant 0 : index
    %41 = vector.load %arg6[%c0_18, %c0_19] : memref<8x128xf32, #tpu.memory_space<vmem>>, vector<8x128xf32>
    tpu.vector_store %arg6[%c0_18, %c0_19], %3 {strides = array<i32>} : memref<8x128xf32, #tpu.memory_space<vmem>>, vector<8x128xf32>,
    return
  }
  func.func @transform_0(%arg0: i32, %arg1: i32) -> (i32, i32) {
    %c0_i32 = arith.constant 0 : i32
    %c0_i32_0 = arith.constant 0 : i32
    return %arg1, %c0_i32 : i32, i32
  }
  func.func @transform_1(%arg0: i32, %arg1: i32) -> (i32, i32) {
    %c0_i32 = arith.constant 0 : i32
    %c0_i32_0 = arith.constant 0 : i32
    return %arg1, %c0_i32 : i32, i32
  }
  func.func @transform_2(%arg0: i32, %arg1: i32) -> (i32, i32) {
    %c0_i32 = arith.constant 0 : i32
    %c0_i32_0 = arith.constant 0 : i32
    return %c0_i32, %arg0 : i32, i32
  }
  func.func @transform_3(%arg0: i32, %arg1: i32) -> (i32, i32) {
    %c0_i32 = arith.constant 0 : i32
    return %arg1, %arg0 : i32, i32
  }
  func.func @transform_4(%arg0: i32, %arg1: i32) -> (i32, i32) {
    %c0_i32 = arith.constant 0 : i32
    return %arg1, %arg0 : i32, i32
  }
}

</mosaic_0001>

<bundles_post_ra>
// kernel: tpu_custom_call.1
= control target key start
LH: loop header
LB: loop body
LE: loop exit
PB: predicated region body
PF: predicated region fallthrough
CT: control target
= control target key end

     0   :  { %10 = vsyncpa [#allocation3], 0  ;;  %s1201_s0 = inlined_call_operand.vmem [shape: s32[16,1], index: 0, kind: input, shape index: {}]   ;;  %s1202_s1 = inlined_call_operand.vmem [shape: bf16[16,32], index: 1, kind: input, shape index: {}]   ;;  %s1203_s2 = inlined_call_operand.hbm [shape: bf16[32,256], index: 2, kind: input, shape index: {}]   ;;  %s1204_s3 = inlined_call_operand.hbm [shape: f32[16,256], index: 3, kind: output, shape index: {0}]   ;;  %s1205_s4 = inlined_call_operand.hbm [shape: f32[16,256], index: 4, kind: output, shape index: {1}]  }
   0x1   :  { %12 = vsyncpa [#allocation3 + $0x1], 0 }
   0x2   :  { %13 = vsyncpa [#allocation4], 0 }
   0x3   :  { %15 = vsyncpa [#allocation4 + $0x1], 0 }
   0x4   :  { %16 = vsyncpa [#allocation7], 0 }
   0x5   :  { %18 = vsyncpa [#allocation7 + $0x1], 0  ;;  %s925_s15 = smov 0   ;;  %s927_s16 = smov 0  }
   0x6   :  { %s929_s17 = smov 0   ;;  %s931_s18 = smov 0  }
   0x7   :  { %s933_s19 = smov 0   ;;  %s935_s20 = smov 0  }
   0x8   :  { %s937_s21 = smov 0   ;;  %s939_s22 = smov 0  }
   0x9   :  { %s941_s23 = smov 0   ;;  %s943_s24 = smov 0  }
   0xa   :  { %s945_s25 = smov 0  }
   0xb LB: > { %s551_s26 = sadd.s32 4294967295, %s889_s25   ;;  %s552_s27 = sadd.s32 4294967294, %s889_s25   ;;  %s889_s25 = sphi %s945_s25, %s24_s25   ;;  %s885_s24 = sphi %s943_s24, %s1231_s24   ;;  %s881_s23 = sphi %s941_s23, %s1230_s23   ;;  %s877_s22 = sphi %s939_s22, %s1229_s22   ;;  %s873_s21 = sphi %s937_s21, %s1228_s21   ;;  %s869_s20 = sphi %s935_s20, %s1227_s20   ;;  %s865_s19 = sphi %s933_s19, %s1226_s19   ;;  %s861_s18 = sphi %s931_s18, %s1225_s18   ;;  %s857_s17 = sphi %s929_s17, %s1224_s17   ;;  %s853_s16 = sphi %s927_s16, %s1223_s16   ;;  %s849_s15 = sphi %s925_s15, %s1222_s15  }
   0xc   : > { %s33_s28 = sadd.s32 1, %s881_s23  ;;  %s36_s29 = sadd.s32 1, %s885_s24 }
   0xd   : > { %p34_p0 = scmp.ge.s32.totalorder %s33_s28, 2  ;;  %s95_s30 = sadd.s32 1, %s869_s20 }
   0xe   : > { %p102_p1 = scmp.ne.s32.totalorder %s869_s20, %s865_s19  ;;  %p103_p2 = scmp.eq.s32.totalorder %s889_s25, 0 }
   0xf   : > { %s1233_s28 = smov (%p34_p0, %s33_s28), 0  ;;  %s1235_s29 = smov (!%p34_p0, %s36_s29), %s885_s24 }
  0x10   : > { %1210 = sst [smem:[#allocation11_spill]] %s1233_s28  ;;  %p989_p3 = por %p103_p2, %p102_p1 }
  0x11   : > { %p108_p4 = scmp.ne.s32.totalorder %s865_s19, %s861_s18  ;;  %p38_p5 = scmp.ge.s32.totalorder %s1235_s29, 2 }
  0x12   : > { %p109_p6 = scmp.eq.s32.totalorder %s551_s26, 0  ;;  %s118_s6 = ssub.s32 %s881_s23, %s1233_s28 }
  0x13   : > { %s123_s7 = sadd.s32 1, %s857_s17  ;;  %s1237_s29 = smov (%p38_p5, %s1235_s29), 0 }
  0x14   : > { %1212 = sst [smem:[#allocation12_spill]] %s1237_s29  ;;  %p999_p7 = por %p109_p6, %p108_p4 }
  0x15   : > { %p133_p8 = scmp.ne.s32.totalorder %s857_s17, %s853_s16  ;;  %s92_s9 = ssub.s32 %s885_s24, %s1237_s29 }
  0x16   : > { %p134_p9 = scmp.eq.s32.totalorder %s551_s26, 3  ;;  %p93_p10 = scmp.eq.s32.totalorder %s92_s9, 0 }
  0x17   : > { %s120_s10 = sor.u32 %s118_s6, %s92_s9  ;;  %p139_p13 = scmp.ne.s32.totalorder %s853_s16, %s849_s15 }
  0x18   : > { %p121_p11 = scmp.eq.s32.totalorder %s120_s10, 0  ;;  %p1007_p12 = por %p134_p9, %p133_p8 }
  0x19   : > { %s1012_s12 = scalar_select %p93_p10, %s869_s20, %s95_s30  }
  0x1a   : > { %s1214_s11 = scalar_select %p1007_p12, 1, 0 }
  0x1b   : > { %s1015_s13 = scalar_select %p121_p11, %s857_s17, %s123_s7  }
  0x1c   : > { %p140_p0 = scmp.eq.s32.totalorder %s552_s27, 3  ;;  %p604_p1 = scmp.lt.s32.totalorder %s889_s25, 4 }
  0x1d   : > { %s202_s18 = sand.u32 1, %s869_s20   ;;  %s556_s6 = sshll.u32 %s885_s24, 6 }
  0x1e   : > { %p1020_p2 = por %p140_p0, %p139_p13  ;;  %s555_s26 = sshll.u32 %s202_s18, 4 }
  0x1f   : > { %s1029_s29 = scalar_lea.hbm %s1203_s2, %s556_s6  ;;  %s206_s30 = scalar_lea.vmem [#allocation2], %s555_s26 }
  0x20   : > { %s1215_s14 = scalar_select %p1020_p2, 1, 0 }
  0x21   : > { %s212_s7 = sshll.u32 %s206_s30, 4  ;;  %p1035_p4 = pnand %p604_p1, %p989_p3  ;;  %s1031_s7 = int_to_ptr.vmem [resolvable:$true] %s212_s7 }
  0x22   : > { %s1039_s28 = scalar_lea.sflag [#allocation3], %s202_s18  ;;  %s705_s9 = scalar_lea.hbm %s1029_s29, 256 }
  0x23   : > { %p706_p5 = scmp.ne.s32.totalorder %s1029_s29, %s705_s9  ;;  %p707_p6 = pneg %p1035_p4 }
  0x24   : > { %s710_s5 = scalar_lea.hbm %s1203_s2, 512  ;;  %p711_p3 = scmp.lt.u32.totalorder %s1029_s29, %s1203_s2 }
  0x25   : > { %p708_p8 = pnand %p707_p6, %p706_p5  ;;  %p712_p10 = scmp.lt.u32.totalorder %s710_s5, %s705_s9 }
  0x26   : > { %p714_p13 = scmp.lt.u32.totalorder %s705_s9, %s1029_s29 }
  0x27   : > { %p709_p9 = pneg %p708_p8  ;;  %p713_p11 = por %p712_p10, %p711_p3 }
  0x29   : > { %p715_p0 = por %p714_p13, %p713_p11 }
  0x2b   : > { %p716_p1 = pnand %p715_p0, %p709_p9 }
  0x2d   : > { %719 = shalt.err (!%p716_p1)
}
  0x2e   : > { %s720_s18 = scalar_lea.vmem %s1031_s7, 256  ;;  %s891_s26 = smov [#allocation2]  }
  0x2f   : > { %p721_p5 = scmp.ne.s32.totalorder %s1031_s7, %s720_s18  ;;  %s725_s6 = sshll.u32 %s891_s26, 4  ;;  %s726_s6 = int_to_ptr.vmem [resolvable:$false] %s725_s6 }
  0x30   : > { %s727_s10 = scalar_lea.vmem %s726_s6, 512  ;;  %p728_p12 = scmp.lt.s32.totalorder %s1031_s7, %s726_s6 }
  0x31   : > { %p723_p8 = pnand %p721_p5, %p707_p6  ;;  %p729_p3 = scmp.lt.s32.totalorder %s727_s10, %s720_s18 }
  0x33   : > { %p724_p2 = pneg %p723_p8  ;;  %p730_p10 = por %p729_p3, %p728_p12 }
  0x35   : > { %p731_p11 = pnand %p730_p10, %p724_p2 }
  0x37   : > { %734 = shalt.err (!%p731_p11)
}
  0x38   : > { %s892_s9 = smov 128   ;;  %s893_s5 = smov 64  }
  0x39   : > { %s894_s30 = smov 4   ;;  %p557_p6 = scmp.ge.s32.totalorder %s889_s25, 1 }
  0x3a   : > { %596 = dma.hbm_to_vmem [thread:$0]  (!%p1035_p4), %s1029_s29, 256, %s1031_s7, %s1039_s28, %s892_s9, %s893_s5, %s894_s30  }
  0x3b   : > { %p220_p9 = scmp.lt.s32.totalorder %s889_s25, 5 }
  0x3d   : > { %p221_p13 = pnand %p557_p6, %p220_p9 }
  0x3e   : > { %s226_s18 = sand.u32 (!%p221_p13), 1, %s865_s19  }
  0x3f   : > { %224 = sbr.rel (%p221_p13) target bundleno = 482 (0x1e2), region = 32  ;;  %s558_s26 = sshll.u32 (!%p221_p13), %s226_s18, 4 }
  0x40   : > { %s227_s6 = scalar_lea.sflag (!%p221_p13), [#allocation3], %s226_s18  ;;  %s230_s10 = scalar_lea.vmem (!%p221_p13), [#allocation2], %s558_s26 }
  0x46   : > { %836 = dma.done.wait (%p999_p7), %s227_s6, 256  }
  0x47   : > { %838 = vsyncadd (%p999_p7), %s227_s6, 4294967040  ;;  %p268_p12 = scmp.lt.s32.totalorder %s873_s21, 1  ;;  %v895_v0 = vmov 0.0   ;;  %vm896_vm0 = vmmov 0   ;;  %v897_v1 = vmov 0   ;;  %v701_v2 = vld [vmem:[%s230_s10] sm:$0xff]   ;;  %v340_v6 = vlaneseq }
  0x48   : > { %579 = vmatprep.subr.bf16.mxu0 %v895_v0  ;;  %583 = vmatprep.mubr.msk.bf16.mxu0 %vm896_vm0, %v895_v0  ;;  %v702_v3 = vld [vmem:[%s230_s10 + $0x8] sm:$0xff]   ;;  %vm295_vm1 = vcmask 261120   ;;  %s566_s26 = sshll.u32 %s877_s22, 7  ;;  %s1084_s6 = sand.u32 1, %s853_s16  }
  0x49   : > { %s269_s28 = scalar_select %p268_p12, %s873_s21, 1  ;;  %700 = vset.pattern.permute.xlu0 %v897_v1  ;;  %580 = vmatpush3.bf16.msra.mxu0 %v701_v2  ;;  %v341_v7 = vand.u32 127, %v340_v6  ;;  %v342_v8 = vstv %s566_s26 }
  0x4a   : > { %581 = vmatprep.subr.bf16.mxu0 %v895_v0  ;;  %s559_s10 = sshll.u32 %s1084_s6, 3  ;;  %p1217_p2 = scmp.ne.s32.totalorder %s1214_s11, 0 }
  0x4b   : > { %s561_s29 = sshll.u32 %s269_s28, 3  ;;  %s562_s8 = sshll.u32 %s269_s28, 2  ;;  %v1086_v9 = vadd.s32 %v342_v8, %v341_v7 }
  0x4c   : > { %s271_s9 = scalar_lea.vmem %s1201_s0, %s561_s29  ;;  %s275_s18 = scalar_lea.vmem %s1202_s1, %s562_s8 }
  0x4d   : > { %v282_v4 = vld [vmem:[%s271_s9] sm:$0xff]  ;;  %582 = vmatpush3.bf16.msra.mxu0 %v702_v3  ;;  %s267_s28 = scalar_lea.vmem [#allocation6], %s559_s10  ;;  %s570_s29 = sshll.u32 %s873_s21, 1 }
  0x4e   : > { %345 = vperm.xlu0 %700, %v282_v4   ;;  %v277_v5 = vld [vmem:[%s275_s18] sm:$0xf]  ;;  %s1100_s7 = sadd.s32 %s877_s22, %s570_s29  ;;  %s410_s30 = sshll.u32 %s267_s28, 4  ;;  %s411_s30 = int_to_ptr.vmem [resolvable:$true] %s410_s30 }
  0x4f   : > { %s1209_s27 = sshll.u32 %s1100_s7, 7  ;;  %s380_s18 = scalar_lea.sflag [#allocation7], %s1084_s6 }
  0x50   : > { %584 = vmatmul.mubr.msk.bf16.vlgmr.msra.gmra.mrb[0].mxu0 %vm295_vm1, %v277_v5  ;;  %s1108_s5 = scalar_lea.hbm %s1205_s4, %s1209_s27  ;;  %s735_s26 = scalar_lea.vmem %s411_s30, 128 }
  0x51   : > { %p736_p7 = scmp.ne.s32.totalorder %s411_s30, %s735_s26  ;;  %s898_s21 = smov [#allocation6]  }
  0x52   : > { %s739_s22 = sshll.u32 %s898_s21, 4  ;;  %s740_s22 = int_to_ptr.vmem [resolvable:$false] %s739_s22 }
  0x53   : > { %p737_p4 = pnand %p736_p7, %p1217_p2  ;;  %s741_s29 = scalar_lea.vmem %s740_s22, 256 }
  0x54   : > { %p742_p1 = scmp.lt.s32.totalorder %s411_s30, %s740_s22  ;;  %p743_p5 = scmp.lt.s32.totalorder %s741_s29, %s735_s26 }
  0x55   : > { %p738_p0 = pneg %p737_p4 }
  0x56   : > { %p744_p8 = por %p743_p5, %p742_p1 }
  0x58   : > { %p745_p3 = pnand %p744_p8, %p738_p0 }
  0xcd   : > { %v1088_v10 = vpop.permute.xlu0 %345 }
  0xce   : > { %vm347_vm2 = vcmp.eq.s32.totalorder %v1086_v9, %v1088_v10 }
 0x123   : > { %v333_v11 = vpop.f32.mrb[0].mxu0 }
 0x124   : > { %373 = vst [vmem:[%s267_s28] sm:$0xff] %v333_v11  ;;  %v585_v12 = vpop.f32.mrb[1].mxu0  ;;  %v348_v13 = vsel %vm347_vm2, %v333_v11, 0.0 }
 0x125   : > { %349 = vadd.xlane.f32.xlu0 %v348_v13  ;;  %v336_v14 = vpop.f32.mrb[2].mxu0 }
 0x126   : > { %v586_v15 = vpop.f32.mrb[3].mxu0 }
 0x127   : > { %748 = shalt.err (!%p745_p3)
}
 0x128   : > { %s749_s28 = scalar_lea.hbm %s1108_s5, 128  ;;  %s753_s21 = scalar_lea.hbm %s1205_s4, 512 }
 0x129   : > { %p750_p10 = scmp.ne.s32.totalorder %s1108_s5, %s749_s28  ;;  %p754_p9 = scmp.lt.u32.totalorder %s1108_s5, %s1205_s4 }
 0x12a   : > { %p755_p13 = scmp.lt.u32.totalorder %s753_s21, %s749_s28  ;;  %p757_p7 = scmp.lt.u32.totalorder %s749_s28, %s1108_s5 }
 0x12b   : > { %p751_p11 = pnand %p750_p10, %p1217_p2 }
 0x12c   : > { %p756_p12 = por %p755_p13, %p754_p9 }
 0x12d   : > { %p752_p6 = pneg %p751_p11 }
 0x12e   : > { %p758_p4 = por %p757_p7, %p756_p12 }
 0x130   : > { %p759_p0 = pnand %p758_p4, %p752_p6 }
 0x132   : > { %762 = shalt.err (!%p759_p0)
}
 0x133   : > { %590 = dma.vmem_to_hbm [thread:$0]  (%p1217_p2), %s411_s30, 128, %s1108_s5, %s380_s18   ;;  %v369_v32 = vmul.f32 30.0, %v333_v11 }
 0x134   : > { %s260_s27 = scalar_lea.vmem [#allocation5], %s559_s10  ;;  %s1218_s30 = sshll.u32 %s1100_s7, 7 }
 0x135   : > { %s395_s5 = sshll.u32 %s260_s27, 4  ;;  %s1138_s29 = scalar_lea.hbm %s1204_s3, %s1218_s30  ;;  %s1140_s5 = int_to_ptr.vmem [resolvable:$true] %s395_s5 }
 0x136   : > { %s375_s10 = scalar_lea.sflag [#allocation4], %s1084_s6  ;;  %s763_s28 = scalar_lea.vmem %s1140_s5, 128 }
 0x137   : > { %p764_p1 = scmp.ne.s32.totalorder %s1140_s5, %s763_s28  ;;  %s899_s9 = smov [#allocation5]  }
 0x138   : > { %s767_s8 = sshll.u32 %s899_s9, 4  ;;  %s768_s8 = int_to_ptr.vmem [resolvable:$false] %s767_s8 }
 0x139   : > { %p765_p5 = pnand %p764_p1, %p1217_p2  ;;  %s769_s7 = scalar_lea.vmem %s768_s8, 256 }
 0x13a   : > { %p770_p3 = scmp.lt.s32.totalorder %s1140_s5, %s768_s8  ;;  %p771_p10 = scmp.lt.s32.totalorder %s769_s7, %s763_s28 }
 0x13b   : > { %p766_p8 = pneg %p765_p5 }
 0x13c   : > { %p772_p11 = por %p771_p10, %p770_p3 }
 0x13e   : > { %p773_p6 = pnand %p772_p11, %p766_p8 }
 0x1b2   : > { %v350_v16 = vpop.xlane.xlu0 %349 }
 0x1b3   : > { %v351_v17 = vmul.f32 %v350_v16, %v350_v16  ;;  %v361_v25 = vmul.f32 0.87758255, %v350_v16  ;;  %v567_v28 = vadd.f32 -0.23971277, %v350_v16  ;;  %vm364_vm5 = vcmp.gt.f32.partialorder %v350_v16, -0.87758255 }
 0x1b5   : > { %v352_v18 = vsub.f32 1.0, %v351_v17 }
 0x1b7   : > { %v353_v19 = vmax.f32 %v352_v18, 0.0 }
 0x1b9   : > { %703 = vrsqrt.f32 %v353_v19  ;;  %vm356_vm3 = vcmp.eq.f32.partialorder %v353_v19, inf  ;;  %v359_v22 = vand.u32 2147483648, %v353_v19  ;;  %vm358_vm4 = vcmp.eq.f32.partialorder %v353_v19, 0.0 }
 0x1c3   : > { %v704_v20 = vpop.eup %703 }
 0x1c4   : > { %v355_v21 = vmul.f32 %v704_v20, %v353_v19 }
 0x1c6   : > { %v357_v23 = vsel %vm356_vm3, %v353_v19, %v355_v21 }
 0x1c7   : > { %v360_v24 = vsel %vm358_vm4, %v359_v22, %v357_v23 }
 0x1c8   : > { %v362_v26 = vmul.f32 0.47942555, %v360_v24 }
 0x1ca   : > { %v363_v27 = vsub.f32 %v361_v25, %v362_v26 }
 0x1cc   : > { %v366_v29 = vsel %vm364_vm5, %v363_v27, %v567_v28 }
 0x1cd   : > { %v367_v30 = vsub.f32 %v366_v29, %v350_v16 }
 0x1cf   : > { %v368_v31 = vmul.f32 30.0, %v367_v30 }
 0x1d1   : > { %v370_v33 = vsel %vm347_vm2, %v368_v31, 0.0 }
 0x1d2   : > { %v371_v34 = vadd.f32 %v370_v33, %v369_v32 }
 0x1d4   : > { %372 = vst [vmem:[%s260_s27] sm:$0xff] %v371_v34 }
 0x1d5   : > { %776 = shalt.err (!%p773_p6)
}
 0x1d6   : > { %s777_s6 = scalar_lea.hbm %s1138_s29, 128  ;;  %s781_s27 = scalar_lea.hbm %s1204_s3, 512 }
 0x1d7   : > { %p778_p9 = scmp.ne.s32.totalorder %s1138_s29, %s777_s6  ;;  %p782_p7 = scmp.lt.u32.totalorder %s1138_s29, %s1204_s3 }
 0x1d8   : > { %p783_p4 = scmp.lt.u32.totalorder %s781_s27, %s777_s6  ;;  %p785_p1 = scmp.lt.u32.totalorder %s777_s6, %s1138_s29 }
 0x1d9   : > { %p779_p13 = pnand %p778_p9, %p1217_p2 }
 0x1da   : > { %p784_p0 = por %p783_p4, %p782_p7 }
 0x1db   : > { %p780_p12 = pneg %p779_p13 }
 0x1dc   : > { %p786_p5 = por %p785_p1, %p784_p0 }
 0x1de   : > { %p787_p8 = pnand %p786_p5, %p780_p12 }
 0x1e0   : > { %790 = shalt.err (!%p787_p8)
}
 0x1e1   : > { %589 = dma.vmem_to_hbm [thread:$0]  (%p1217_p2), %s1140_s5, 128, %s1138_s29, %s375_s10  }
 0x1e2 PF: > { %p605_p3 = scmp.ge.s32.totalorder %s889_s25, 2  ;;  %s422_s26 = sand.u32 1, %s849_s15  }
 0x1e3   : > { %p1219_p10 = scmp.ne.s32.totalorder %s1215_s14, 0  ;;  %s423_s28 = scalar_lea.sflag [#allocation4], %s422_s26 }
 0x1e5   : > { %p598_p11 = pnand %p605_p3, %p1219_p10 }
 0x1e7   : > { %840 = dma.done.wait (!%p598_p11), %s423_s28, 128  }
 0x1e8   : > { %842 = vsyncadd (!%p598_p11), %s423_s28, 4294967168  ;;  %s432_s9 = scalar_lea.sflag [#allocation7], %s422_s26 }
 0x1e9   : > { %844 = dma.done.wait (!%p598_p11), %s432_s9, 128  }
 0x1ea   : > { %846 = vsyncadd (!%p598_p11), %s432_s9, 4294967168  ;;  %s24_s25 = sadd.s32 1, %s889_s25   ;;  %s1220_s11 = sld [smem:[#allocation11_spill]] }
 0x1eb   : > { %p21_p6 = scmp.ge.s32.totalorder %s24_s25, 6   ;;  %s1221_s14 = sld [smem:[#allocation12_spill]] }
 0x1ec   : > { %s1222_s15 = smov %s853_s16  ;;  %s1223_s16 = smov %s857_s17 }
 0x1ed   : > { %s1224_s17 = smov %s1015_s13  ;;  %s1225_s18 = smov %s865_s19 }
 0x1ee   : > { %s1226_s19 = smov %s869_s20  ;;  %s1227_s20 = smov %s1012_s12 }
 0x1ef   : > { %s1228_s21 = smov %s881_s23  ;;  %s1229_s22 = smov %s885_s24 }
 0x1f0   : > { %s1230_s23 = smov %s1220_s11  ;;  %23 = sbr.rel (!%p21_p6) target bundleno = 11 (0xb), region = 100 }
 0x1f1   : > { %s1231_s24 = smov %s1221_s14 }
 0x1f7   :  { %437 = vsyncpa [#allocation3], 1 }
 0x1f8   :  { %439 = vsyncpa [#allocation3 + $0x1], 1 }
 0x1f9   :  { %440 = vsyncpa [#allocation4], 1 }
 0x1fa   :  { %442 = vsyncpa [#allocation4 + $0x1], 1 }
 0x1fb   :  { %443 = vsyncpa [#allocation7], 1 }
 0x1fc   :  { %445 = vsyncpa [#allocation7 + $0x1], 1 }

</bundles_post_ra>
